<compile_context>
chip_gen: v6e
topology: v6e:2x2x1
jax: 0.10.0
libtpu: 0.0.40
codegen_flags: <defaults>
</compile_context>

<pallas_src>
import functools

import jax
import jax.numpy as jnp
from jax.experimental import pallas as pl
from jax.experimental.pallas import tpu as pltpu


# ----------------------------------------------------------------------------
# Kernel: one (batch, out-channel, row-tile) block of the expanded output
# ----------------------------------------------------------------------------
def _expand_kernel(x_ref, c_ref, o_ref, *, s, ws):
    # x_ref: (1, s, s, 1, TH, W)   input row-tile, split by (row-phase i, col-phase j)
    # c_ref: (s, W, W*s)           column-interleave selection matrices C_j
    # o_ref: (1, 1, TH, s*W*s)     output tile; lane segment i holds row-phase i
    th = x_ref.shape[4]

    for i in range(s):                       # static unroll (s is tiny, e.g. 2)
        m_i = jnp.zeros((th, ws), jnp.float32)
        for j in range(s):
            # m_i[t, w*s + j] = x[i, j, t, w]  (exact 0/1 selection matmul on the MXU)
            m_i = m_i + jnp.dot(x_ref[0, i, j, 0, :, :], c_ref[j],
                                preferred_element_type=jnp.float32)
        # Row-phase i lands in lane segment [i*W*s, (i+1)*W*s); the final contiguous
        # reshape in the wrapper turns this into output row h*s + i for free.
        o_ref[0, 0, :, i * ws:(i + 1) * ws] = m_i.astype(o_ref.dtype)


# ----------------------------------------------------------------------------
# Wrapper
# ----------------------------------------------------------------------------
def _pick_row_tile(h, w, s, itemsize, budget_bytes=8 << 20):
    """Largest row tile TH (multiple of 8, dividing H) fitting a small VMEM budget."""
    if h % 8 != 0:
        return h                      # block == full dim is always legal
    best = 8
    th = 8
    while th <= h:
        if h % th == 0:
            # in-block + out-block, each double-buffered by the pipeline
            blk_bytes = 2 * (2 * s * s * th * w) * itemsize
            if blk_bytes <= budget_bytes:
                best = th
        th += 8
    return best


def expand(x, gain=2):
    s = int(gain)
    B, C, H, W = x.shape
    assert C % (s * s) == 0, "channels must be divisible by gain**2"
    c2 = C // (s * s)
    dtype = x.dtype
    itemsize = jnp.dtype(dtype).itemsize

    Ws = W * s
    TH = _pick_row_tile(H, W, s, itemsize)

    # Free, contiguous reshape: channel axis -> (row-phase i, col-phase j, out-chan k).
    x6 = x.reshape(B, s, s, c2, H, W)

    # Exact 0/1 column-selection matrices C_j[w, w*s + j] = 1 (constant across grid).
    col = jnp.arange(Ws)
    base = jnp.arange(W)[:, None] * s
    Cs = jnp.stack([(col[None, :] == (base + j)).astype(dtype) for j in range(s)],
                   axis=0)                                   # (s, W, W*s)

    grid = (B, c2, H // TH)

    flops = 2 * B * c2 * H * (s * s) * W * Ws                # selection matmuls
    bytes_accessed = 2 * B * C * H * W * itemsize + Cs.size * itemsize

    y = pl.pallas_call(
        functools.partial(_expand_kernel, s=s, ws=Ws),
        out_shape=jax.ShapeDtypeStruct((B, c2, H, s * Ws), dtype),
        grid=grid,
        in_specs=[
            pl.BlockSpec((1, s, s, 1, TH, W), lambda b, k, h: (b, 0, 0, k, h, 0)),
            pl.BlockSpec((s, W, Ws), lambda b, k, h: (0, 0, 0)),
        ],
        out_specs=pl.BlockSpec((1, 1, TH, s * Ws), lambda b, k, h: (b, k, h, 0)),
        compiler_params=pltpu.CompilerParams(
            dimension_semantics=("parallel", "parallel", "parallel"),
            vmem_limit_bytes=32 * 1024 * 1024),
        cost_estimate=pl.CostEstimate(flops=flops, transcendentals=0,
                                      bytes_accessed=bytes_accessed),
    )(x6, Cs)

    # Free, contiguous reshape: (B, c2, H, s*W*s) -> (B, c2, H*s, W*s)
    # (absorbs the row interleave: lane segment i of row h == output row h*s + i).
    return y.reshape(B, c2, H * s, Ws)


# ----------------------------------------------------------------------------
# Pure-JAX reference (mirrors the PyTorch module)
# ----------------------------------------------------------------------------
def expand_ref(x, gain=2):
    b, c, h, w = x.shape
    s = gain
    c2 = c // (s * s)
    y = x.reshape(b, s, s, c2, h, w)
    y = jnp.transpose(y, (0, 3, 4, 1, 5, 2))
    return y.reshape(b, c2, h * s, w * s)


if __name__ == "__main__":
    key = jax.random.PRNGKey(0)
    N, C, H, W = 2, 4, 16, 16          # gain=2 -> out (2, 1, 32, 32)
    gain = 2

    x = jax.random.normal(key, (N, C, H, W), jnp.float32)

    run = jax.jit(functools.partial(expand, gain=gain))
    out = jax.block_until_ready(run(x))

    ref = jax.block_until_ready(expand_ref(x, gain=gain))
    assert out.shape == (N, C // gain ** 2, H * gain, W * gain), out.shape
    assert jnp.allclose(out, ref, atol=1e-5, rtol=1e-5), float(jnp.max(jnp.abs(out - ref)))

    print("KERNEL_OK")
</pallas_src>

<mosaic_0001>
module attributes {stable_mosaic.version = 11 : i64} {
  func.func @_expand_kernel(%arg0: i32, %arg1: i32, %arg2: i32, %arg3: memref<1x2x2x1x16x16xf32, #tpu.memory_space<vmem>>, %arg4: memref<2x16x32xf32, #tpu.memory_space<vmem>>, %arg5: memref<1x1x16x64xf32, #tpu.memory_space<vmem>>) attributes {dimension_semantics = [#tpu.dimension_semantics<parallel>, #tpu.dimension_semantics<parallel>, #tpu.dimension_semantics<parallel>], iteration_bounds = array<i64: 2, 1, 1>, scalar_prefetch = 0 : i64, scratch_operands = 0 : i64, tpu.core_type = #tpu.core_type<tc>, window_params = [{transform_indices = @transform_0, window_bounds = array<i64: 1, 2, 2, 1, 16, 16>}, {pipeline_mode = #tpu.pipeline_mode<synchronous>, transform_indices = @transform_1, window_bounds = array<i64: 2, 16, 32>}, {transform_indices = @transform_2, window_bounds = array<i64: 1, 1, 16, 64>}]} {
    %cst = arith.constant 0.000000e+00 : f32
    %0 = vector.broadcast %cst : f32 to vector<16x32xf32>
    %c0 = arith.constant 0 : index
    %c0_0 = arith.constant 0 : index
    %c0_1 = arith.constant 0 : index
    %c0_2 = arith.constant 0 : index
    %c0_3 = arith.constant 0 : index
    %c0_4 = arith.constant 0 : index
    %1 = vector.load %arg3[%c0, %c0_0, %c0_1, %c0_2, %c0_3, %c0_4] : memref<1x2x2x1x16x16xf32, #tpu.memory_space<vmem>>, vector<1x1x1x1x16x16xf32>
    %2 = vector.shape_cast %1 : vector<1x1x1x1x16x16xf32> to vector<16x16xf32>
    %c0_5 = arith.constant 0 : index
    %c0_6 = arith.constant 0 : index
    %c0_7 = arith.constant 0 : index
    %3 = vector.load %arg4[%c0_5, %c0_6, %c0_7] : memref<2x16x32xf32, #tpu.memory_space<vmem>>, vector<1x16x32xf32>
    %4 = vector.shape_cast %3 : vector<1x16x32xf32> to vector<16x32xf32>
    %cst_8 = arith.constant dense<0.000000e+00> : vector<16x32xf32>
    %5 = tpu.matmul %2, %4, %cst_8 {dimension_numbers = #tpu.dot_dimension_numbers<[1], [0], [0], [1], [0, 0, 1, 1], [], []>} : vector<16x16xf32>, vector<16x32xf32>, vector<16x32xf32> -> vector<16x32xf32>
    %6 = arith.addf %0, %5 : vector<16x32xf32>
    %c0_9 = arith.constant 0 : index
    %c0_10 = arith.constant 0 : index
    %c1 = arith.constant 1 : index
    %c0_11 = arith.constant 0 : index
    %c0_12 = arith.constant 0 : index
    %c0_13 = arith.constant 0 : index
    %7 = vector.load %arg3[%c0_9, %c0_10, %c1, %c0_11, %c0_12, %c0_13] : memref<1x2x2x1x16x16xf32, #tpu.memory_space<vmem>>, vector<1x1x1x1x16x16xf32>
    %8 = vector.shape_cast %7 : vector<1x1x1x1x16x16xf32> to vector<16x16xf32>
    %c1_14 = arith.constant 1 : index
    %c0_15 = arith.constant 0 : index
    %c0_16 = arith.constant 0 : index
    %9 = vector.load %arg4[%c1_14, %c0_15, %c0_16] : memref<2x16x32xf32, #tpu.memory_space<vmem>>, vector<1x16x32xf32>
    %10 = vector.shape_cast %9 : vector<1x16x32xf32> to vector<16x32xf32>
    %cst_17 = arith.constant dense<0.000000e+00> : vector<16x32xf32>
    %11 = tpu.matmul %8, %10, %cst_17 {dimension_numbers = #tpu.dot_dimension_numbers<[1], [0], [0], [1], [0, 0, 1, 1], [], []>} : vector<16x16xf32>, vector<16x32xf32>, vector<16x32xf32> -> vector<16x32xf32>
    %12 = arith.addf %6, %11 : vector<16x32xf32>
    %c0_18 = arith.constant 0 : index
    %c0_19 = arith.constant 0 : index
    %c0_20 = arith.constant 0 : index
    %c0_21 = arith.constant 0 : index
    %13 = vector.load %arg5[%c0_18, %c0_19, %c0_20, %c0_21] : memref<1x1x16x64xf32, #tpu.memory_space<vmem>>, vector<1x1x16x32xf32>
    %14 = vector.shape_cast %13 : vector<1x1x16x32xf32> to vector<16x32xf32>
    %15 = vector.shape_cast %12 : vector<16x32xf32> to vector<1x1x16x32xf32>
    tpu.vector_store %arg5[%c0_18, %c0_19, %c0_20, %c0_21], %15 {strides = array<i32>} : memref<1x1x16x64xf32, #tpu.memory_space<vmem>>, vector<1x1x16x32xf32>,
    %cst_22 = arith.constant 0.000000e+00 : f32
    %16 = vector.broadcast %cst_22 : f32 to vector<16x32xf32>
    %c0_23 = arith.constant 0 : index
    %c1_24 = arith.constant 1 : index
    %c0_25 = arith.constant 0 : index
    %c0_26 = arith.constant 0 : index
    %c0_27 = arith.constant 0 : index
    %c0_28 = arith.constant 0 : index
    %17 = vector.load %arg3[%c0_23, %c1_24, %c0_25, %c0_26, %c0_27, %c0_28] : memref<1x2x2x1x16x16xf32, #tpu.memory_space<vmem>>, vector<1x1x1x1x16x16xf32>
    %18 = vector.shape_cast %17 : vector<1x1x1x1x16x16xf32> to vector<16x16xf32>
    %c0_29 = arith.constant 0 : index
    %c0_30 = arith.constant 0 : index
    %c0_31 = arith.constant 0 : index
    %19 = vector.load %arg4[%c0_29, %c0_30, %c0_31] : memref<2x16x32xf32, #tpu.memory_space<vmem>>, vector<1x16x32xf32>
    %20 = vector.shape_cast %19 : vector<1x16x32xf32> to vector<16x32xf32>
    %cst_32 = arith.constant dense<0.000000e+00> : vector<16x32xf32>
    %21 = tpu.matmul %18, %20, %cst_32 {dimension_numbers = #tpu.dot_dimension_numbers<[1], [0], [0], [1], [0, 0, 1, 1], [], []>} : vector<16x16xf32>, vector<16x32xf32>, vector<16x32xf32> -> vector<16x32xf32>
    %22 = arith.addf %16, %21 : vector<16x32xf32>
    %c0_33 = arith.constant 0 : index
    %c1_34 = arith.constant 1 : index
    %c1_35 = arith.constant 1 : index
    %c0_36 = arith.constant 0 : index
    %c0_37 = arith.constant 0 : index
    %c0_38 = arith.constant 0 : index
    %23 = vector.load %arg3[%c0_33, %c1_34, %c1_35, %c0_36, %c0_37, %c0_38] : memref<1x2x2x1x16x16xf32, #tpu.memory_space<vmem>>, vector<1x1x1x1x16x16xf32>
    %24 = vector.shape_cast %23 : vector<1x1x1x1x16x16xf32> to vector<16x16xf32>
    %c1_39 = arith.constant 1 : index
    %c0_40 = arith.constant 0 : index
    %c0_41 = arith.constant 0 : index
    %25 = vector.load %arg4[%c1_39, %c0_40, %c0_41] : memref<2x16x32xf32, #tpu.memory_space<vmem>>, vector<1x16x32xf32>
    %26 = vector.shape_cast %25 : vector<1x16x32xf32> to vector<16x32xf32>
    %cst_42 = arith.constant dense<0.000000e+00> : vector<16x32xf32>
    %27 = tpu.matmul %24, %26, %cst_42 {dimension_numbers = #tpu.dot_dimension_numbers<[1], [0], [0], [1], [0, 0, 1, 1], [], []>} : vector<16x16xf32>, vector<16x32xf32>, vector<16x32xf32> -> vector<16x32xf32>
    %28 = arith.addf %22, %27 : vector<16x32xf32>
    %c0_43 = arith.constant 0 : index
    %c0_44 = arith.constant 0 : index
    %c0_45 = arith.constant 0 : index
    %c32 = arith.constant 32 : index
    %29 = vector.load %arg5[%c0_43, %c0_44, %c0_45, %c32] : memref<1x1x16x64xf32, #tpu.memory_space<vmem>>, vector<1x1x16x32xf32>
    %30 = vector.shape_cast %29 : vector<1x1x16x32xf32> to vector<16x32xf32>
    %31 = vector.shape_cast %28 : vector<16x32xf32> to vector<1x1x16x32xf32>
    tpu.vector_store %arg5[%c0_43, %c0_44, %c0_45, %c32], %31 {strides = array<i32>} : memref<1x1x16x64xf32, #tpu.memory_space<vmem>>, vector<1x1x16x32xf32>,
    return
  }
  func.func @transform_0(%arg0: i32, %arg1: i32, %arg2: i32) -> (i32, i32, i32, i32, i32, i32) {
    %c0_i32 = arith.constant 0 : i32
    %c0_i32_0 = arith.constant 0 : i32
    %c0_i32_1 = arith.constant 0 : i32
    %c0_i32_2 = arith.constant 0 : i32
    return %arg0, %c0_i32, %c0_i32_0, %arg1, %arg2, %c0_i32_1 : i32, i32, i32, i32, i32, i32
  }
  func.func @transform_1(%arg0: i32, %arg1: i32, %arg2: i32) -> (i32, i32, i32) {
    %c0_i32 = arith.constant 0 : i32
    %c0_i32_0 = arith.constant 0 : i32
    %c0_i32_1 = arith.constant 0 : i32
    %c0_i32_2 = arith.constant 0 : i32
    return %c0_i32, %c0_i32_0, %c0_i32_1 : i32, i32, i32
  }
  func.func @transform_2(%arg0: i32, %arg1: i32, %arg2: i32) -> (i32, i32, i32, i32) {
    %c0_i32 = arith.constant 0 : i32
    %c0_i32_0 = arith.constant 0 : i32
    return %arg0, %arg1, %arg2, %c0_i32 : i32, i32, i32, i32
  }
}

</mosaic_0001>

<bundles_post_ra>
// kernel: expand.1
= control target key start
LH: loop header
LB: loop body
LE: loop exit
PB: predicated region body
PF: predicated region fallthrough
CT: control target
= control target key end

     0   :  { %7 = vsyncpa [#allocation3], 0  ;;  %s1048_s0 = inlined_call_operand.hbm [shape: f32[2,2,2,1,16,16], index: 0, kind: input, shape index: {}]   ;;  %s1049_s1 = inlined_call_operand.vmem [shape: f32[2,16,32], index: 1, kind: input, shape index: {}]   ;;  %s1050_s2 = inlined_call_operand.vmem [shape: f32[2,1,16,64], index: 2, kind: output, shape index: {}]  }
   0x1   :  { %9 = vsyncpa [#allocation3 + $0x1], 0  ;;  %s922_s9 = smov 0   ;;  %s924_s10 = smov 0  }
   0x2   :  { %s926_s11 = smov 0   ;;  %s928_s12 = smov 0  }
   0x3   :  { %s930_s13 = smov 0   ;;  %s932_s14 = smov 0  }
   0x4 LB: > { %s688_s15 = sadd.s32 4294967295, %s901_s14   ;;  %s34_s16 = sadd.s32 1, %s897_s13  ;;  %s901_s14 = sphi %s932_s14, %s15_s14   ;;  %s897_s13 = sphi %s930_s13, %s1058_s13   ;;  %s893_s12 = sphi %s928_s12, %s1057_s12   ;;  %s889_s11 = sphi %s926_s11, %s1056_s11   ;;  %s885_s10 = sphi %s924_s10, %s1055_s10   ;;  %s881_s9 = sphi %s922_s9, %s1054_s9  }
   0x5   : > { %p36_p0 = scmp.ge.s32.totalorder %s34_s16, 2  ;;  %s45_s17 = sadd.s32 1, %s889_s11 }
   0x6   : > { %p52_p1 = scmp.ne.s32.totalorder %s889_s11, %s885_s10  ;;  %p53_p2 = scmp.eq.s32.totalorder %s901_s14, 0 }
   0x7   : > { %s1060_s16 = smov (%p36_p0, %s34_s16), 0  ;;  %p58_p4 = scmp.ne.s32.totalorder %s885_s10, %s881_s9 }
   0x8   : > { %p958_p3 = por %p53_p2, %p52_p1  ;;  %s38_s19 = ssub.s32 %s897_s13, %s1060_s16 }
   0x9   : > { %p59_p5 = scmp.eq.s32.totalorder %s688_s15, 0  ;;  %p43_p6 = scmp.eq.s32.totalorder %s38_s19, 0 }
   0xa   : > { %p771_p8 = scmp.lt.s32.totalorder %s901_s14, 2  ;;  %s136_s22 = sand.u32 1, %s889_s11  }
   0xb   : > { %p965_p7 = por %p59_p5, %p58_p4  ;;  %s719_s23 = sshll.u32 %s897_s13, 10 }
   0xc   : > { %s971_s21 = scalar_select %p43_p6, %s889_s11, %s45_s17  }
   0xd   : > { %s692_s24 = sshll.u32 %s136_s22, 6  ;;  %s150_s27 = scalar_lea.hbm %s1048_s0, %s719_s23 }
   0xe   : > { %s140_s28 = scalar_lea.vmem [#allocation2], %s692_s24  ;;  %p980_p9 = pnand %p771_p8, %p958_p3 }
   0xf   : > { %s151_s29 = sshll.u32 %s140_s28, 4  ;;  %s137_s3 = scalar_lea.sflag [#allocation3], %s136_s22  ;;  %s152_s29 = int_to_ptr.vmem [resolvable:$true] %s151_s29 }
  0x10   : > { %p825_p10 = pneg %p980_p9  ;;  %s836_s4 = scalar_lea.vmem %s152_s29, 1024 }
  0x11   : > { %p837_p11 = scmp.ne.s32.totalorder %s152_s29, %s836_s4  ;;  %s903_s5 = smov [#allocation2]  }
  0x12   : > { %s841_s6 = sshll.u32 %s903_s5, 4  ;;  %s842_s6 = int_to_ptr.vmem [resolvable:$false] %s841_s6 }
  0x13   : > { %p839_p12 = pnand %p837_p11, %p825_p10  ;;  %s843_s7 = scalar_lea.vmem %s842_s6, 2048 }
  0x14   : > { %p844_p0 = scmp.lt.s32.totalorder %s152_s29, %s842_s6  ;;  %p845_p1 = scmp.lt.s32.totalorder %s843_s7, %s836_s4 }
  0x15   : > { %p840_p13 = pneg %p839_p12 }
  0x16   : > { %p846_p2 = por %p845_p1, %p844_p0 }
  0x18   : > { %p847_p3 = pnand %p846_p2, %p840_p13 }
  0x1a   : > { %850 = shalt.err (!%p847_p3)
}
  0x1b   : > { %s904_s8 = smov 128   ;;  %s905_s9 = smov 8  }
  0x1c   : > { %770 = dma.hbm_to_vmem [thread:$0]  (!%p980_p9), %s150_s27, 1024, %s152_s29, %s137_s3, %s904_s8, %s904_s8, %s905_s9  }
  0x1d   : > { %p695_p4 = scmp.ge.s32.totalorder %s901_s14, 1  ;;  %p159_p5 = scmp.lt.s32.totalorder %s901_s14, 3 }
  0x1f   : > { %p160_p6 = pnand %p695_p4, %p159_p5 }
  0x20   : > { %s165_s15 = sand.u32 (!%p160_p6), 1, %s885_s10  }
  0x21   : > { %163 = sbr.rel (%p160_p6) target bundleno = 368 (0x170), region = 28  ;;  %s696_s17 = sshll.u32 (!%p160_p6), %s165_s15, 6 }
  0x22   : > { %s166_s18 = scalar_lea.sflag (!%p160_p6), [#allocation3], %s165_s15  ;;  %s991_s19 = scalar_lea.vmem (!%p160_p6), [#allocation2], %s696_s17 }
  0x26   : > { %876 = dma.done.wait (%p965_p7), %s166_s18, 1024  }
  0x27   : > { %878 = vsyncadd (%p965_p7), %s166_s18, 4294966272  ;;  %v702_v0 = vld [vmem:[%s1049_s1 + $0x18] sm:$0xff]  ;;  %v216_v1 = vld [vmem:[%s1049_s1 + $0x8] sm:$0xff]  ;;  %vm223_vm0 = vcmask 130048   ;;  %p200_p7 = scmp.lt.s32.totalorder %s893_s12, 1  ;;  %vm386_vm1 = vcmask 261120  }
  0x28   : > { %v701_v2 = vld [vmem:[%s1049_s1 + $0x10] sm:$0xff]  ;;  %737 = vmatprep.subr.mxu0 %v702_v0  ;;  %744 = vmatprep.subr.mxu1 %v216_v1  ;;  %v215_v3 = vld [vmem:[%s1049_s1] sm:$0xff]  ;;  %v700_v6 = vld [vmem:[%s991_s19 + $0x18] sm:$0xff]  ;;  %s906_s5 = smov 32   ;;  %vm569_vm2 = vcmask 523520  }
  0x29   : > { %v699_v4 = vld [vmem:[%s991_s19 + $0x10] sm:$0xff]  ;;  %738 = vmatpush3.msra.mxu0 %v702_v0  ;;  %745 = vmatpush3.msra.mxu1 %v216_v1  ;;  %v213_v5 = vld [vmem:[%s991_s19] sm:$0xff]  ;;  %v214_v7 = vld [vmem:[%s991_s19 + $0x8] sm:$0xff]  ;;  %s1062_s12 = smov (!%p200_p7, %s893_s12), 1 }
  0x2a   : > { %739 = vmatprep.subr.mxu0 %v701_v2  ;;  %746 = vmatprep.subr.mxu1 %v215_v3  ;;  %v709_v8 = vld [vmem:[%s991_s19 + $0x30] sm:$0xff]  ;;  %v707_v9 = vld [vmem:[%s991_s19 + $0x20] sm:$0xff]  ;;  %v710_v10 = vld [vmem:[%s991_s19 + $0x38] sm:$0xff]  ;;  %s720_s29 = sshll.u32 %s1062_s12, 4 }
  0x2b   : > { %740 = vmatpush3.msra.mxu0 %v701_v2  ;;  %741 = vmatprep.mubr.msk.f32.mxu0 %vm223_vm0, %v699_v4  ;;  %v708_v11 = vld [vmem:[%s991_s19 + $0x28] sm:$0xff]  ;;  %s211_s4 = scalar_lea.vmem %s1050_s2, %s720_s29 }
  0x2c   : > { %747 = vmatpush3.msra.mxu1 %v215_v3  ;;  %748 = vmatprep.mubr.msk.f32.mxu1 %vm223_vm0, %v213_v5 }
  0x2d   : > { %742 = vmatmul.mubr.msk.f32.vlgmr.msra.gmra.mxu0 %vm223_vm0, %v700_v6  ;;  %749 = vmatmul.mubr.msk.f32.vlgmr.msra.gmra.mxu1 %vm223_vm0, %v214_v7 }
  0x2e   : > { %751 = vmatprep.subr.mxu0 %v702_v0  ;;  %758 = vmatprep.subr.mxu1 %v216_v1 }
  0x2f   : > { %752 = vmatpush3.msra.mxu0 %v702_v0  ;;  %759 = vmatpush3.msra.mxu1 %v216_v1 }
  0x30   : > { %753 = vmatprep.subr.mxu0 %v701_v2  ;;  %760 = vmatprep.subr.mxu1 %v215_v3 }
  0x31   : > { %754 = vmatpush3.msra.mxu0 %v701_v2  ;;  %755 = vmatprep.mubr.msk.f32.mxu0 %vm223_vm0, %v709_v8 }
  0x32   : > { %761 = vmatpush3.msra.mxu1 %v215_v3  ;;  %762 = vmatprep.mubr.msk.f32.mxu1 %vm223_vm0, %v707_v9 }
  0x33   : > { %756 = vmatmul.mubr.msk.f32.vlgmr.msra.gmra.mxu0 %vm223_vm0, %v710_v10  ;;  %763 = vmatmul.mubr.msk.f32.vlgmr.msra.gmra.mxu1 %vm223_vm0, %v708_v11 }
  0xed   : > { %v743_v12 = vpop.f32.mrf.mxu0  ;;  %v750_v13 = vpop.f32.mrf.mxu1 }
  0xee   : > { %v383_v14 = vadd.f32 %v750_v13, %v743_v12 }
  0xef   : > { %v296_v15 = vpop.f32.mrf.mxu0  ;;  %v377_v16 = vpop.f32.mrf.mxu1 }
  0xf0   : > { %388 = vst.msk [vmem:[%s211_s4 + $0x8] sm:$0xff] %vm386_vm1, %v383_v14  ;;  %v378_v17 = vadd.f32 %v377_v16, %v296_v15 }
  0xf2   : > { %387 = vst.msk [vmem:[%s211_s4] sm:$0xff] %vm386_vm1, %v378_v17 }
  0xf3   : > { %v757_v18 = vpop.f32.mrf.mxu0  ;;  %v764_v19 = vpop.f32.mrf.mxu1 }
  0xf4   : > { %v558_v23 = vadd.f32 %v764_v19, %v757_v18 }
  0xf5   : > { %v471_v20 = vpop.f32.mrf.mxu0  ;;  %v552_v21 = vpop.f32.mrf.mxu1 }
  0xf6   : > { %v553_v22 = vadd.f32 %v552_v21, %v471_v20 }
  0xf8   : > { %563 = vrot.lane.b32.xlu0 %v553_v22, %s906_s5 }
  0xfc   : > { %565 = vrot.lane.b32.xlu0 %v558_v23, %s906_s5 }
 0x16a   : > { %v564_v24 = vpop.permute.xlu0 %563 }
 0x16b   : > { %570 = vst.msk [vmem:[%s211_s4] sm:$0xff] %vm569_vm2, %v564_v24 }
 0x16e   : > { %v566_v25 = vpop.permute.xlu0 %565 }
 0x16f   : > { %571 = vst.msk [vmem:[%s211_s4 + $0x8] sm:$0xff] %vm569_vm2, %v566_v25 }
 0x170 PF: > { %s15_s14 = sadd.s32 1, %s901_s14   ;;  %s1054_s9 = smov %s885_s10 }
 0x171   : > { %p12_p8 = scmp.ge.s32.totalorder %s15_s14, 4   ;;  %s1055_s10 = smov %s889_s11 }
 0x172   : > { %s1056_s11 = smov %s971_s21  ;;  %s1057_s12 = smov %s897_s13 }
 0x173   : > { %s1058_s13 = smov %s1060_s16  ;;  %14 = sbr.rel (!%p12_p8) target bundleno = 4 (0x4), region = 72 }
 0x178   :  { %610 = vsyncpa [#allocation3], 1 }
 0x179   :  { %612 = vsyncpa [#allocation3 + $0x1], 1 }

</bundles_post_ra>
